<compile_context>
chip_gen: v7x
topology: tpu7x:2x2x1
jax: 0.10.0
libtpu: 0.0.40
codegen_flags: <defaults>
</compile_context>

<pallas_src>
import jax
import jax.numpy as jnp
from jax.experimental import pallas as pl
from jax.experimental.pallas import tpu as pltpu


# ----------------------------- Pallas kernel -------------------------------

def _decoder_kernel(a_ref, w_ref, b_ref, x_ref):
    # One MXU push: (P, 2S) @ (2S, tile_n) -> (P, tile_n), f32 accumulation,
    # plus a lane-broadcast bias add on the VPU.
    x = jnp.dot(w_ref[...], a_ref[...], preferred_element_type=jnp.float32)
    x_ref[...] = (x + b_ref[...]).astype(x_ref.dtype)


# ------------------------------ helpers ------------------------------------

def _stable_softplus(x):
    # log(1 + exp(x)) without overflow for large positive x.
    return jnp.maximum(x, 0.0) + jnp.log1p(jnp.exp(-jnp.abs(x)))


def _round_up(x, m):
    return (x + m - 1) // m * m


def _pick_tile_n(n_pad, max_tile=2048):
    # Largest multiple of 128 that divides n_pad and is <= max_tile.
    t = min(n_pad, max_tile)
    t -= t % 128
    while t > 128 and n_pad % t != 0:
        t -= 128
    return max(t, 128)


def _sample(mu, sigma, key):
    return mu + sigma * jax.random.normal(key, mu.shape, mu.dtype)


def _kl_gaussian(mu, sigma):
    # KL( N(mu, sigma^2) || N(0, 1) ) summed over all entries.
    return 0.5 * jnp.sum(sigma * sigma + mu * mu - 1.0 - 2.0 * jnp.log(sigma))


# ------------------------------ JAX wrapper --------------------------------

@jax.jit
def small_decoder_bayes(enc_s, enc_t, params, key):
    B, S, D = enc_s.shape
    P = params["mu_w_ts"].shape[0]
    N = B * D
    N_pad = _round_up(N, 128)            # lane-dense output stores
    tile_n = _pick_tile_n(N_pad)

    # sigma computed once; shared by weight sampling and analytic KL.
    sig_w_s = _stable_softplus(params["rho_w_s"])
    sig_b_s = _stable_softplus(params["rho_b_s"])
    sig_w_ts = _stable_softplus(params["rho_w_ts"])
    sig_b_ts = _stable_softplus(params["rho_b_ts"])

    k1, k2, k3, k4, k5, k6 = jax.random.split(key, 6)
    # Two independent weight samples of conv_out_s (one per forward call),
    # one sample of conv_out_t_s.
    ws1 = _sample(params["mu_w_s"], sig_w_s, k1)
    bs1 = _sample(params["mu_b_s"], sig_b_s, k2)
    ws2 = _sample(params["mu_w_s"], sig_w_s, k3)
    bs2 = _sample(params["mu_b_s"], sig_b_s, k4)
    wts = _sample(params["mu_w_ts"], sig_w_ts, k5)
    bts = _sample(params["mu_b_ts"], sig_b_ts, k6)

    # KL (tiny, param-sized) stays in the wrapper, fused with the sampling ops.
    kl_s = _kl_gaussian(params["mu_w_s"], sig_w_s) + _kl_gaussian(params["mu_b_s"], sig_b_s)
    kl_ts = _kl_gaussian(params["mu_w_ts"], sig_w_ts) + _kl_gaussian(params["mu_b_ts"], sig_b_ts)
    kl = 2.0 * kl_s + kl_ts  # forward() uses conv_out_s twice

    # Pre-compose the three 1x1 convs and fuse the two branches along K:
    #   x = wts @ (ws1 @ es + bs1 + ws2 @ et + bs2) + bts
    #     = [wts@ws1 | wts@ws2] @ [es; et] + (wts @ (bs1 + bs2) + bts)
    w_cat = jnp.concatenate([jnp.dot(wts, ws1), jnp.dot(wts, ws2)], axis=1)  # (P, 2S)
    b_eff = jnp.dot(wts, bs1 + bs2) + bts                                    # (P, 1)

    # (B,S,D) -> (S, B*D): fold batch into the lane dim (D < 128 here, so the
    # flatten buys lane density).  Stack s/t halves along K, pad lanes to 128.
    es_flat = jnp.transpose(enc_s, (1, 0, 2)).reshape(S, N)
    et_flat = jnp.transpose(enc_t, (1, 0, 2)).reshape(S, N)
    a_cat = jnp.concatenate([es_flat, et_flat], axis=0)                      # (2S, N)
    if N_pad != N:
        a_cat = jnp.pad(a_cat, ((0, 0), (0, N_pad - N)))

    x_pad = pl.pallas_call(
        _decoder_kernel,
        out_shape=jax.ShapeDtypeStruct((P, N_pad), enc_s.dtype),
        grid_spec=pltpu.PrefetchScalarGridSpec(
            num_scalar_prefetch=0,
            grid=(N_pad // tile_n,),
            in_specs=[
                pl.BlockSpec((2 * S, tile_n), lambda i: (0, i)),   # activations, tiled over N
                pl.BlockSpec((P, 2 * S), lambda i: (0, 0)),        # fused weights, resident
                pl.BlockSpec((P, 1), lambda i: (0, 0)),            # bias, un-broadcast
            ],
            out_specs=pl.BlockSpec((P, tile_n), lambda i: (0, i)),
        ),
        compiler_params=pltpu.CompilerParams(
            dimension_semantics=("parallel",)),
        cost_estimate=pl.CostEstimate(
            flops=2 * P * 2 * S * N_pad,
            transcendentals=0,
            bytes_accessed=4 * (2 * S * N_pad + P * 2 * S + P + P * N_pad)),
    )(a_cat, w_cat, b_eff)

    x = jnp.transpose(x_pad[:, :N].reshape(P, B, D), (1, 0, 2))   # (B, P, D)
    return x, kl, (ws1, bs1, ws2, bs2, wts, bts)


def init_params(key, seq_len, pred_len):
    ks = jax.random.split(key, 4)
    return {
        # conv_out_s : Conv1d(seq_len -> seq_len, k=1)
        "mu_w_s": 0.1 * jax.random.normal(ks[0], (seq_len, seq_len), jnp.float32),
        "rho_w_s": jnp.full((seq_len, seq_len), -3.0, jnp.float32),
        "mu_b_s": 0.1 * jax.random.normal(ks[1], (seq_len, 1), jnp.float32),
        "rho_b_s": jnp.full((seq_len, 1), -3.0, jnp.float32),
        # conv_out_t_s : Conv1d(seq_len -> pred_len, k=1)
        "mu_w_ts": 0.1 * jax.random.normal(ks[2], (pred_len, seq_len), jnp.float32),
        "rho_w_ts": jnp.full((pred_len, seq_len), -3.0, jnp.float32),
        "mu_b_ts": 0.1 * jax.random.normal(ks[3], (pred_len, 1), jnp.float32),
        "rho_b_ts": jnp.full((pred_len, 1), -3.0, jnp.float32),
        # conv_out_t exists in __init__ but is unused in forward(); omitted.
    }


# ------------------------------ reference ----------------------------------

def _reference(enc_s, enc_t, params, samples):
    ws1, bs1, ws2, bs2, wts, bts = samples
    # Original three-matmul chain (matches PyTorch forward order).
    xs = jnp.einsum("os,bsd->bod", ws1, enc_s) + bs1[None, :, :]
    xt = jnp.einsum("os,bsd->bod", ws2, enc_t) + bs2[None, :, :]
    x = jnp.einsum("ps,bsd->bpd", wts, xs + xt) + bts[None, :, :]

    def kl_term(mu, rho):
        sigma = jnp.maximum(rho, 0.0) + jnp.log1p(jnp.exp(-jnp.abs(rho)))
        return 0.5 * jnp.sum(sigma ** 2 + mu ** 2 - 1.0 - 2.0 * jnp.log(sigma))

    kl_s = kl_term(params["mu_w_s"], params["rho_w_s"]) + kl_term(params["mu_b_s"], params["rho_b_s"])
    kl_ts = kl_term(params["mu_w_ts"], params["rho_w_ts"]) + kl_term(params["mu_b_ts"], params["rho_b_ts"])
    return x, 2.0 * kl_s + kl_ts


if __name__ == "__main__":
    B, SEQ_LEN, PRED_LEN, D_MODEL = 2, 8, 4, 32

    root = jax.random.PRNGKey(0)
    k_par, k_es, k_et, k_sample = jax.random.split(root, 4)

    params = init_params(k_par, SEQ_LEN, PRED_LEN)
    enc_s = jax.random.normal(k_es, (B, SEQ_LEN, D_MODEL), jnp.float32)
    enc_t = jax.random.normal(k_et, (B, SEQ_LEN, D_MODEL), jnp.float32)

    x, kl, samples = small_decoder_bayes(enc_s, enc_t, params, k_sample)
    jax.block_until_ready((x, kl))

    x_ref, kl_ref = _reference(enc_s, enc_t, params, samples)
    assert x.shape == (B, PRED_LEN, D_MODEL)
    assert jnp.allclose(x, x_ref, atol=1e-4, rtol=1e-4)
    assert jnp.allclose(kl, kl_ref, atol=1e-3, rtol=1e-4)

    print("KERNEL_OK")
</pallas_src>

<mosaic_0001>
module attributes {stable_mosaic.version = 11 : i64} {
  func.func @_decoder_kernel(%arg0: i32, %arg1: memref<16x128xf32, #tpu.memory_space<vmem>>, %arg2: memref<4x16xf32, #tpu.memory_space<vmem>>, %arg3: memref<4x1xf32, #tpu.memory_space<vmem>>, %arg4: memref<4x128xf32, #tpu.memory_space<vmem>>) attributes {dimension_semantics = [#tpu.dimension_semantics<parallel>], iteration_bounds = array<i64: 1>, scalar_prefetch = 0 : i64, scratch_operands = 0 : i64, tpu.core_type = #tpu.core_type<tc>, window_params = [{transform_indices = @transform_0, window_bounds = array<i64: 16, 128>}, {pipeline_mode = #tpu.pipeline_mode<synchronous>, transform_indices = @transform_1, window_bounds = array<i64: 4, 16>}, {pipeline_mode = #tpu.pipeline_mode<synchronous>, transform_indices = @transform_2, window_bounds = array<i64: 4, 1>}, {transform_indices = @transform_3, window_bounds = array<i64: 4, 128>}]} {
    %c0 = arith.constant 0 : index
    %c0_0 = arith.constant 0 : index
    %0 = vector.load %arg2[%c0, %c0_0] : memref<4x16xf32, #tpu.memory_space<vmem>>, vector<4x16xf32>
    %c0_1 = arith.constant 0 : index
    %c0_2 = arith.constant 0 : index
    %1 = vector.load %arg1[%c0_1, %c0_2] : memref<16x128xf32, #tpu.memory_space<vmem>>, vector<16x128xf32>
    %cst = arith.constant dense<0.000000e+00> : vector<4x128xf32>
    %2 = tpu.matmul %0, %1, %cst {dimension_numbers = #tpu.dot_dimension_numbers<[1], [0], [0], [1], [0, 0, 1, 1], [], []>} : vector<4x16xf32>, vector<16x128xf32>, vector<4x128xf32> -> vector<4x128xf32>
    %c0_3 = arith.constant 0 : index
    %c0_4 = arith.constant 0 : index
    %3 = vector.load %arg3[%c0_3, %c0_4] : memref<4x1xf32, #tpu.memory_space<vmem>>, vector<4x1xf32>
    %4 = vector.broadcast %3 : vector<4x1xf32> to vector<4x128xf32>
    %5 = arith.addf %2, %4 : vector<4x128xf32>
    %c0_5 = arith.constant 0 : index
    %c0_6 = arith.constant 0 : index
    %6 = vector.load %arg4[%c0_5, %c0_6] : memref<4x128xf32, #tpu.memory_space<vmem>>, vector<4x128xf32>
    tpu.vector_store %arg4[%c0_5, %c0_6], %5 {strides = array<i32>} : memref<4x128xf32, #tpu.memory_space<vmem>>, vector<4x128xf32>,
    return
  }
  func.func @transform_0(%arg0: i32) -> (i32, i32) {
    %c0_i32 = arith.constant 0 : i32
    %c0_i32_0 = arith.constant 0 : i32
    return %c0_i32, %arg0 : i32, i32
  }
  func.func @transform_1(%arg0: i32) -> (i32, i32) {
    %c0_i32 = arith.constant 0 : i32
    %c0_i32_0 = arith.constant 0 : i32
    %c0_i32_1 = arith.constant 0 : i32
    return %c0_i32, %c0_i32_0 : i32, i32
  }
  func.func @transform_2(%arg0: i32) -> (i32, i32) {
    %c0_i32 = arith.constant 0 : i32
    %c0_i32_0 = arith.constant 0 : i32
    %c0_i32_1 = arith.constant 0 : i32
    return %c0_i32, %c0_i32_0 : i32, i32
  }
  func.func @transform_3(%arg0: i32) -> (i32, i32) {
    %c0_i32 = arith.constant 0 : i32
    %c0_i32_0 = arith.constant 0 : i32
    return %c0_i32, %arg0 : i32, i32
  }
}

</mosaic_0001>

<bundles_post_ra>
// kernel: small_decoder_bayes.3
= control target key start
LH: loop header
LB: loop body
LE: loop exit
PB: predicated region body
PF: predicated region fallthrough
CT: control target
= control target key end

     0   :  { %v121_v0 = vmov 0.0|0.0   ;;  %vm122_vm0 = vmmov 0   ;;  %v123_v3 = vmov 0.0   ;;  %v124_v5 = vmov 0   ;;  %s160_s0 = inlined_call_operand.vmem [shape: f32[16,128], index: 0, kind: input, shape index: {}]   ;;  %s161_s2 = inlined_call_operand.vmem [shape: f32[4,1], index: 2, kind: input, shape index: {}]   ;;  %s162_s1 = inlined_call_operand.vmem [shape: f32[4,16], index: 1, kind: input, shape index: {}]   ;;  %s163_s3 = inlined_call_operand.vmem [shape: f32[4,128], index: 3, kind: output, shape index: {}]  }
   0x1   :  { %113 = vmatprep.subr.bf16.mxu0 %v121_v0  ;;  %v15_v1 = vld [vmem:[%s160_s0] sm:$0xff]  ;;  %v16_v2 = vld [vmem:[%s160_s0 + $0x8] sm:$0xff]  ;;  %110 = vmatprep.mubr.msk.f32.mxu0 %vm122_vm0, %v123_v3  ;;  %vm23_vm1 = vcmask 130048  }
   0x2   :  { %v114_v4 = vpack.c.bf16 %v16_v2, %v15_v1  ;;  %120 = vset.pattern.permute.xlu0 %v124_v5  ;;  %v17_v6 = vld [vmem:[%s161_s2] sm:$0xf] }
   0x3   :  { %20 = vperm.xlu0 %120, %v17_v6   ;;  %v14_v7 = vld [vmem:[%s162_s1] sm:$0xf] }
   0x4   :  { %115 = vmatpush3.bf16.msra.mxu0 %v114_v4 }
   0x7   :  { %111 = vmatmul.mubr.msk.f32.vlgmr.msra.gmra.mrb[0].mxu0 %vm23_vm1, %v14_v7 }
  0x82   :  { %v21_v8 = vpop.permute.xlu0 %20 }
  0xda   :  { %v93_v9 = vpop.f32.mrb[0].mxu0 }
  0xdb   :  { %v94_v10 = vadd.f32 %v93_v9, %v21_v8  ;;  %v112_v11 = vpop.f32.mrb[1].mxu0 }
  0xdd   :  { %97 = vst [vmem:[%s163_s3] sm:$0xf] %v94_v10 }

</bundles_post_ra>
